<compile_context>
chip_gen: v7x
topology: tpu7x:2x2x1
jax: 0.10.0
libtpu: 0.0.40
codegen_flags: <defaults>
</compile_context>

<pallas_src>
from functools import partial

import jax
import jax.numpy as jnp
from jax.experimental import pallas as pl
from jax.experimental.pallas import tpu as pltpu


def _downsample_x_kernel(x_ref, o_ref, *, df, C, pow2):
    # x_ref: (tile_rows, df*C) float32 -- df consecutive frames packed on lanes
    # o_ref: (tile_rows, C)    int32
    x = x_ref[...]
    acc = x[:, 0:C]
    for k in range(1, df):                       # static unroll: (df-1) VPU adds
        acc = acc + x[:, k * C:(k + 1) * C]
    if pow2:
        # 1/df is exact for powers of two -> plain VPU multiply.
        y = acc * jnp.float32(1.0 / df)
    else:
        # True divide: exact-integer quotients stay exact, so the f32->s32
        # truncation matches torch avg_pool1d(...).long() bit-for-bit.
        y = acc / jnp.float32(df)
    o_ref[...] = y.astype(jnp.int32)             # truncates toward zero (== .long())


def downsample_with_mask(x, mask, downsample_factor=2, *, tile_rows=None):
    """Pallas implementation of DownsampleWithMask.forward.

    Args:
      x:    (T, C) array (cast to float32, like the torch module).
      mask: (Tm,)  array (cast to float32).
      downsample_factor: pooling window / stride.
      tile_rows: optional override for the pooled-time tile size.

    Returns:
      (x_out, mask_out): ((T//df, C) int32, (Tm//df,) int32)
    """
    df = int(downsample_factor)
    x = jnp.asarray(x, dtype=jnp.float32)
    mask = jnp.asarray(mask, dtype=jnp.float32)

    T, C = x.shape
    if T < df:
        raise ValueError("Input size must be larger than downsample factor")
    if mask.shape[0] < df:
        raise ValueError("Mask size must be larger than downsample factor")

    Td = T // df
    # Row-major (T, C) -> (Td, df*C): the df frames of each window become
    # contiguous lane slices.  avg_pool1d drops the trailing T % df remainder,
    # same as torch.
    x2 = x[: Td * df].reshape(Td, df * C)

    row_bytes = df * C * 4
    if tile_rows is None:
        # ~2 MiB input blocks (measured near-roofline for tiled mem-bound ops),
        # sublane-aligned (multiple of 8).
        tile_rows = max(8, min(2048, (2 << 20) // max(row_bytes, 1)))
        tile_rows -= tile_rows % 8
    tile_rows = int(tile_rows)
    if Td <= tile_rows:
        tile_rows = Td  # single block; full-extent block dim is always legal

    grid = (pl.cdiv(Td, tile_rows),)

    # Double-buffered VMEM footprint (in + out, 2 buffers each) plus margin.
    in_block_bytes = tile_rows * df * C * 4
    out_block_bytes = tile_rows * C * 4
    vmem_need = 2 * (in_block_bytes + out_block_bytes) + (1 << 20)
    vmem_limit = min(vmem_need, 64 << 20) if vmem_need > (12 << 20) else None

    pow2 = (df & (df - 1)) == 0

    x_out = pl.pallas_call(
        partial(_downsample_x_kernel, df=df, C=C, pow2=pow2),
        grid=grid,
        in_specs=[
            # If profiling still shows exposed DMA on v7x, add
            # pipeline_mode=pl.Buffered(3) here (one extra tile of VMEM).
            pl.BlockSpec((tile_rows, df * C), lambda i: (i, 0)),
        ],
        out_specs=pl.BlockSpec((tile_rows, C), lambda i: (i, 0)),
        out_shape=jax.ShapeDtypeStruct((Td, C), jnp.int32),
        compiler_params=pltpu.CompilerParams(
            # Rows are independent: lets v7x megacore split the grid across
            # both TensorCores; harmless on single-TC v5e/v6e.
            dimension_semantics=("parallel",),
            vmem_limit_bytes=vmem_limit,
        ),
        cost_estimate=pl.CostEstimate(
            flops=Td * C * df,
            transcendentals=0 if pow2 else Td * C,
            bytes_accessed=Td * df * C * 4 + Td * C * 4,
        ),
    )(x2)

    # Mask path in plain JAX (only Tm floats; keeps the Pallas kernel free of
    # last-dim 1/2 layouts).  Pooled over the mask's own length, like torch.
    Tm = mask.shape[0]
    Tdm = Tm // df
    m_avg = mask[: Tdm * df].reshape(Tdm, df).mean(axis=1)
    mask_out = (m_avg >= 0.5).astype(jnp.int32)

    return x_out, mask_out


if __name__ == "__main__":
    key = jax.random.PRNGKey(0)
    k1, k2, k3, k4, k5, k6 = jax.random.split(key, 6)

    # ---- Test 1: tiny shape (single block), default df=2 ----
    T, C, DF = 16, 8, 2
    x = jax.random.randint(k1, (T, C), 0, 100).astype(jnp.float32)
    mask = (jax.random.uniform(k2, (T,)) > 0.3).astype(jnp.float32)

    x_out, mask_out = downsample_with_mask(x, mask, downsample_factor=DF)
    jax.block_until_ready((x_out, mask_out))

    Td = T // DF
    x3 = x[: Td * DF].reshape(Td, DF, C)
    ref_x = (x3.sum(axis=1) * (1.0 / DF)).astype(jnp.int32)
    ref_m = (mask[: Td * DF].reshape(Td, DF).mean(axis=1) >= 0.5).astype(jnp.int32)
    assert x_out.shape == (Td, C) and mask_out.shape == (Td,)
    assert bool(jnp.all(x_out == ref_x)) and bool(jnp.all(mask_out == ref_m))

    # ---- Test 2: multi-block grid with partial last tile (tile_rows=128) ----
    T2, C2, DF2 = 600, 16, 2
    xb = jax.random.randint(k3, (T2, C2), 0, 100).astype(jnp.float32)
    mb = (jax.random.uniform(k4, (T2,)) > 0.5).astype(jnp.float32)

    xo2, mo2 = downsample_with_mask(xb, mb, downsample_factor=DF2, tile_rows=128)
    jax.block_until_ready((xo2, mo2))

    Td2 = T2 // DF2
    xb3 = xb[: Td2 * DF2].reshape(Td2, DF2, C2)
    ref_x2 = (xb3.sum(axis=1) * (1.0 / DF2)).astype(jnp.int32)
    ref_m2 = (mb[: Td2 * DF2].reshape(Td2, DF2).mean(axis=1) >= 0.5).astype(jnp.int32)
    assert xo2.shape == (Td2, C2) and mo2.shape == (Td2,)
    assert bool(jnp.all(xo2 == ref_x2)) and bool(jnp.all(mo2 == ref_m2))

    # ---- Test 3: non-power-of-2 df with time remainder (exact-divide path) ----
    T3, C3, DF3 = 50, 12, 3
    xc = jax.random.randint(k5, (T3, C3), 0, 100).astype(jnp.float32)
    mc = (jax.random.uniform(k6, (T3,)) > 0.5).astype(jnp.float32)

    xo3, mo3 = downsample_with_mask(xc, mc, downsample_factor=DF3)
    jax.block_until_ready((xo3, mo3))

    Td3 = T3 // DF3
    xc3 = xc[: Td3 * DF3].reshape(Td3, DF3, C3)
    ref_x3 = (xc3.sum(axis=1) / jnp.float32(DF3)).astype(jnp.int32)
    ref_m3 = (mc[: Td3 * DF3].reshape(Td3, DF3).mean(axis=1) >= 0.5).astype(jnp.int32)
    assert xo3.shape == (Td3, C3) and mo3.shape == (Td3,)
    assert bool(jnp.all(xo3 == ref_x3)) and bool(jnp.all(mo3 == ref_m3))

    print("KERNEL_OK")
</pallas_src>

<mosaic_0001>
module attributes {stable_mosaic.version = 11 : i64} {
  func.func @_downsample_x_kernel(%arg0: i32, %arg1: memref<8x16xf32, #tpu.memory_space<vmem>>, %arg2: memref<8x8xi32, #tpu.memory_space<vmem>>) attributes {dimension_semantics = [#tpu.dimension_semantics<parallel>], iteration_bounds = array<i64: 1>, scalar_prefetch = 0 : i64, scratch_operands = 0 : i64, tpu.core_type = #tpu.core_type<tc>, window_params = [{transform_indices = @transform_0, window_bounds = array<i64: 8, 16>}, {transform_indices = @transform_1, window_bounds = array<i64: 8, 8>}]} {
    %c0 = arith.constant 0 : index
    %c0_0 = arith.constant 0 : index
    %0 = vector.load %arg1[%c0, %c0_0] : memref<8x16xf32, #tpu.memory_space<vmem>>, vector<8x16xf32>
    %1 = vector.extract_strided_slice %0 {offsets = [0, 0], sizes = [8, 8], strides = [1, 1]} : vector<8x16xf32> to vector<8x8xf32>
    %2 = vector.extract_strided_slice %0 {offsets = [0, 8], sizes = [8, 8], strides = [1, 1]} : vector<8x16xf32> to vector<8x8xf32>
    %3 = arith.addf %1, %2 : vector<8x8xf32>
    %cst = arith.constant 5.000000e-01 : f32
    %4 = vector.broadcast %cst : f32 to vector<8x8xf32>
    %5 = arith.mulf %3, %4 : vector<8x8xf32>
    %6 = arith.fptosi %5 : vector<8x8xf32> to vector<8x8xi32>
    %c0_1 = arith.constant 0 : index
    %c0_2 = arith.constant 0 : index
    %7 = vector.load %arg2[%c0_1, %c0_2] : memref<8x8xi32, #tpu.memory_space<vmem>>, vector<8x8xi32>
    tpu.vector_store %arg2[%c0_1, %c0_2], %6 {strides = array<i32>} : memref<8x8xi32, #tpu.memory_space<vmem>>, vector<8x8xi32>,
    return
  }
  func.func @transform_0(%arg0: i32) -> (i32, i32) {
    %c0_i32 = arith.constant 0 : i32
    %c0_i32_0 = arith.constant 0 : i32
    return %arg0, %c0_i32 : i32, i32
  }
  func.func @transform_1(%arg0: i32) -> (i32, i32) {
    %c0_i32 = arith.constant 0 : i32
    %c0_i32_0 = arith.constant 0 : i32
    return %arg0, %c0_i32 : i32, i32
  }
}

</mosaic_0001>

<bundles_post_ra>
// kernel: tpu_custom_call.1
= control target key start
LH: loop header
LB: loop body
LE: loop exit
PB: predicated region body
PF: predicated region fallthrough
CT: control target
= control target key end

     0   :  { %6 = vsyncpa [#allocation3], 0  ;;  %s136_s0 = inlined_call_operand.hbm [shape: f32[8,16], index: 0, kind: input, shape index: {}]   ;;  %s137_s1 = inlined_call_operand.hbm [shape: s32[8,8], index: 1, kind: output, shape index: {}]  }
   0x1   :  { %7 = vsyncpa [#allocation4], 0  ;;  %s99_s6 = smov [#allocation2]   ;;  %s51_s10 = scalar_lea.hbm %s136_s0, 128 }
   0x2   :  { %s14_s7 = sshll.u32 %s99_s6, 4  ;;  %p52_p0 = scmp.ne.s32.totalorder %s136_s0, %s51_s10  ;;  %s15_s7 = int_to_ptr.vmem [resolvable:$true] %s14_s7 }
   0x3   :  { %p55_p1 = scmp.lt.u32.totalorder %s51_s10, %s136_s0 }
   0x5   :  { %p57_p2 = pnand %p55_p1, %p52_p0 }
   0x7   :  { %60 = shalt.err (!%p57_p2)
}
   0x8   :  { %s61_s15 = scalar_lea.vmem %s15_s7, 128  ;;  %p66_p4 = scmp.lt.s32.totalorder %s15_s7, %s15_s7 }
   0x9   :  { %p62_p3 = scmp.ne.s32.totalorder %s15_s7, %s61_s15  ;;  %p67_p5 = scmp.lt.s32.totalorder %s61_s15, %s61_s15 }
   0xb   :  { %p68_p6 = por %p67_p5, %p66_p4 }
   0xd   :  { %p69_p7 = pnand %p68_p6, %p62_p3 }
   0xf   :  { %72 = shalt.err (!%p69_p7)
}
  0x10   :  { %17 = dma.hbm_to_vmem [thread:$0]  %s136_s0, 128, %s15_s7, [#allocation3]  }
  0x11   :  { %95 = dma.done.wait [#allocation3], 128  }
  0x12   :  { %96 = vsyncadd [#allocation3], 4294967168  ;;  %v21_v0 = vld [vmem:[#allocation2] sm:$0xff]  ;;  %s100_s18 = smov 120   ;;  %s101_s19 = smov [#allocation5]   ;;  %vm29_vm0 = vcmask 64512  }
  0x13   :  { %23 = vrot.lane.b32.xlu0 %v21_v0, %s100_s18  ;;  %s37_s20 = sshll.u32 %s101_s19, 4  ;;  %s38_s20 = int_to_ptr.vmem [resolvable:$true] %s37_s20 }
  0x14   :  { %s73_s21 = scalar_lea.vmem %s38_s20, 128  ;;  %p78_p9 = scmp.lt.s32.totalorder %s38_s20, %s38_s20 }
  0x15   :  { %p74_p8 = scmp.ne.s32.totalorder %s38_s20, %s73_s21  ;;  %p79_p10 = scmp.lt.s32.totalorder %s73_s21, %s73_s21 }
  0x17   :  { %p80_p11 = por %p79_p10, %p78_p9 }
  0x19   :  { %p81_p12 = pnand %p80_p11, %p74_p8 }
  0x85   :  { %v24_v1 = vpop.permute.xlu0 %23 }
  0x86   :  { %v26_v2 = vadd.f32 %v24_v1, %v21_v0 }
  0x88   :  { %v27_v3 = vmul.f32 0.5, %v26_v2 }
  0x8a   :  { %v46_v4 = vtrunc.f32 %v27_v3 }
  0x8c   :  { %v47_v5 = vcvt.f32.s32 %v46_v4 }
  0x8e   :  { %30 = vst.msk [vmem:[#allocation5] sm:$0xff] %vm29_vm0, %v47_v5 }
  0x8f   :  { %84 = shalt.err (!%p81_p12)
}
  0x90   :  { %s85_s23 = scalar_lea.hbm %s137_s1, 128 }
  0x91   :  { %p86_p13 = scmp.ne.s32.totalorder %s137_s1, %s85_s23  ;;  %p89_p0 = scmp.lt.u32.totalorder %s85_s23, %s137_s1 }
  0x93   :  { %p91_p1 = pnand %p89_p0, %p86_p13 }
  0x95   :  { %94 = shalt.err (!%p91_p1)
}
  0x96   :  { %40 = dma.vmem_to_hbm [thread:$0]  %s38_s20, 128, %s137_s1, [#allocation4]  }
  0x97   :  { %97 = dma.done.wait [#allocation4], 128  }
  0x98   :  { %98 = vsyncadd [#allocation4], 4294967168 }
  0x99   :  { %44 = vsyncpa [#allocation3], 1 }
  0x9a   :  { %45 = vsyncpa [#allocation4], 1 }

</bundles_post_ra>
